<compile_context>
chip_gen: v6e
topology: v6e:2x2x1
jax: 0.10.0
libtpu: 0.0.40
codegen_flags: <defaults>
</compile_context>

<pallas_src>
from collections import OrderedDict

import jax
import jax.numpy as jnp
from jax.experimental import pallas as pl
from jax.experimental.pallas import tpu as pltpu


# ---------------------------------------------------------------------------
# Pallas kernel: tiled (TM,TK)@(TK,TN) matmul fused with bias + ReLU.
# Grid = (Cout-tiles, M-tiles, K-tiles); K is innermost / "arbitrary".
# ---------------------------------------------------------------------------
def _matmul_bias_relu_kernel(p_ref, w_ref, b_ref, o_ref, acc_ref):
    k = pl.program_id(2)

    @pl.when(k == 0)
    def _init():
        acc_ref[...] = jnp.zeros_like(acc_ref)

    acc_ref[...] += jnp.dot(p_ref[...], w_ref[...],
                            preferred_element_type=jnp.float32)

    @pl.when(k == pl.num_programs(2) - 1)
    def _finalize():
        o_ref[...] = jnp.maximum(acc_ref[...] + b_ref[...], 0.0).astype(o_ref.dtype)


def _round_up(x, m):
    return ((x + m - 1) // m) * m


def _pick_tile(full, candidates):
    for c in candidates:
        if full % c == 0:
            return c
    return full


def conv3x3_s2_relu_nhwc(x, w, b):
    """Fused 3x3 stride-2 conv + bias + ReLU.

    x: (N, H, W, Cin) f32 (NHWC), w: (Cout, Cin, 3, 3) (PyTorch OIHW),
    b: (Cout,).  Returns (N, Ho, Wo, Cout) f32 (NHWC).
    """
    N, H, W, Cin = x.shape
    Cout = w.shape[0]
    Ho = (H + 2 - 3) // 2 + 1
    Wo = (W + 2 - 3) // 2 + 1

    # im2col in NHWC: flat K index = (kh*3 + kw) * Cin + cin (channels minor).
    xp = jnp.pad(x, ((0, 0), (1, 1), (1, 1), (0, 0)))
    taps = []
    for kh in range(3):
        for kw in range(3):
            taps.append(xp[:, kh:kh + 2 * Ho - 1:2, kw:kw + 2 * Wo - 1:2, :])
    patches = jnp.stack(taps, axis=3)                # (N, Ho, Wo, 9, Cin)

    M = N * Ho * Wo
    K = 9 * Cin
    patches = patches.reshape(M, K)

    # Pad to lane/sublane-friendly, tile-divisible shapes.
    Kp = _round_up(K, 128)
    Coutp = _round_up(Cout, 128)
    TM = min(512, _round_up(M, 8))
    Mp = _round_up(M, TM)
    TK = _pick_tile(Kp, (512, 384, 256, 128))
    TN = _pick_tile(Coutp, (256, 128))

    # bf16 MXU inputs, f32 accumulation + epilogue.
    patches_p = jnp.pad(patches, ((0, Mp - M), (0, Kp - K))).astype(jnp.bfloat16)
    w2 = jnp.transpose(w, (2, 3, 1, 0)).reshape(K, Cout)      # (9*Cin, Cout)
    w2_p = jnp.pad(w2, ((0, Kp - K), (0, Coutp - Cout))).astype(jnp.bfloat16)
    b2_p = jnp.pad(b.reshape(1, Cout), ((0, 0), (0, Coutp - Cout))).astype(jnp.float32)

    grid = (Coutp // TN, Mp // TM, Kp // TK)

    cost = pl.CostEstimate(
        flops=2 * Mp * Kp * Coutp,
        transcendentals=0,
        bytes_accessed=(Mp * Kp + Kp * Coutp) * 2 + Coutp * 4 + Mp * Coutp * 4,
    )

    out = pl.pallas_call(
        _matmul_bias_relu_kernel,
        out_shape=jax.ShapeDtypeStruct((Mp, Coutp), jnp.float32),
        grid_spec=pltpu.PrefetchScalarGridSpec(
            num_scalar_prefetch=0,
            grid=grid,
            in_specs=[
                # activations tile depends on (M, K) grid axes
                pl.BlockSpec((TM, TK), lambda j, i, k: (i, k)),
                # weight / bias tiles are independent of the M axis
                pl.BlockSpec((TK, TN), lambda j, i, k: (k, j)),
                pl.BlockSpec((1, TN), lambda j, i, k: (0, j)),
            ],
            out_specs=pl.BlockSpec((TM, TN), lambda j, i, k: (i, j)),
            scratch_shapes=[pltpu.VMEM((TM, TN), jnp.float32)],
        ),
        compiler_params=pltpu.CompilerParams(
            dimension_semantics=("parallel", "parallel", "arbitrary"),
            vmem_limit_bytes=32 * 1024 * 1024,
        ),
        cost_estimate=cost,
    )(patches_p, w2_p, b2_p)

    out = out[:M, :Cout].reshape(N, Ho, Wo, Cout)    # stays NHWC for next layer
    return out


class BackboneBase:
    """JAX/Pallas equivalent of the PyTorch BackboneBase.

    `train_backbone` only toggles requires_grad in PyTorch (no effect on the
    forward computation), so it is accepted but unused here.
    """

    def __init__(self, backbone_params, train_backbone, num_channels, return_interm_layers):
        del train_backbone  # gradient flags have no forward-pass semantics
        self.params = backbone_params  # [(w1, b1), ..., (w4, b4)]
        if return_interm_layers:
            self.return_layers = {"layer1": "0", "layer2": "1", "layer3": "2", "layer4": "3"}
        else:
            self.return_layers = {"layer4": "0"}
        self.num_channels = num_channels
        self._forward = jax.jit(self._forward_impl)

    def _forward_impl(self, params, tensor_list):
        # IntermediateLayerGetter: run layers in order, collect requested outputs.
        x = jnp.transpose(tensor_list, (0, 2, 3, 1))          # NCHW -> NHWC once
        xs = OrderedDict()
        for name, (w, b) in zip(["layer1", "layer2", "layer3", "layer4"], params):
            x = conv3x3_s2_relu_nhwc(x, w, b)
            if name in self.return_layers:
                # Only returned feature maps pay the NHWC -> NCHW transpose.
                xs[self.return_layers[name]] = jnp.transpose(x, (0, 3, 1, 2))
        return xs

    def forward(self, tensor_list):
        return self._forward(self.params, tensor_list)

    __call__ = forward


def _make_backbone_params(key, in_channels, widths):
    params = []
    cin = in_channels
    for cout in widths:
        key, kw, kb = jax.random.split(key, 3)
        w = 0.1 * jax.random.normal(kw, (cout, cin, 3, 3), dtype=jnp.float32)
        b = 0.01 * jax.random.normal(kb, (cout,), dtype=jnp.float32)
        params.append((w, b))
        cin = cout
    return params


def _reference_conv3x3_s2_relu(x, w, b):
    y = jax.lax.conv_general_dilated(
        x, w, window_strides=(2, 2), padding=((1, 1), (1, 1)),
        dimension_numbers=("NCHW", "OIHW", "NCHW"))
    return jnp.maximum(y + b[None, :, None, None], 0.0)


if __name__ == "__main__":
    key = jax.random.PRNGKey(0)
    key, kx = jax.random.split(key)

    # Small synthetic config: batch=2, in_channels=4, spatial=16, widths 8..64.
    x = jax.random.normal(kx, (2, 4, 16, 16), dtype=jnp.float32)
    widths = (8, 16, 32, 64)
    params = _make_backbone_params(key, 4, widths)

    model = BackboneBase(params, train_backbone=True, num_channels=widths[-1],
                         return_interm_layers=False)
    xs = model(x)
    out = xs["0"]
    jax.block_until_ready(out)

    # Correctness check against XLA's f32 conv on the same params.
    # Tolerance loosened (5e-2) because the Pallas matmul feeds bf16 inputs to
    # the MXU (f32 accumulation keeps the error small but above 1e-4).
    ref = x
    for (w, b) in params:
        ref = _reference_conv3x3_s2_relu(ref, w, b)
    assert out.shape == (2, 64, 1, 1), out.shape
    assert jnp.allclose(out, ref, atol=5e-2, rtol=5e-2), "mismatch vs reference conv"

    print("KERNEL_OK")
</pallas_src>

<mosaic_0001>
module attributes {stable_mosaic.version = 11 : i64} {
  func.func @_matmul_bias_relu_kernel(%arg0: i32, %arg1: i32, %arg2: i32, %arg3: memref<128x128xbf16, #tpu.memory_space<vmem>>, %arg4: memref<128x128xbf16, #tpu.memory_space<vmem>>, %arg5: memref<1x128xf32, #tpu.memory_space<vmem>>, %arg6: memref<128x128xf32, #tpu.memory_space<vmem>>, %arg7: memref<128x128xf32, #tpu.memory_space<vmem>>) attributes {dimension_semantics = [#tpu.dimension_semantics<parallel>, #tpu.dimension_semantics<parallel>, #tpu.dimension_semantics<arbitrary>], iteration_bounds = array<i64: 1, 1, 1>, scalar_prefetch = 0 : i64, scratch_operands = 1 : i64, tpu.core_type = #tpu.core_type<tc>, window_params = [{transform_indices = @transform_0, window_bounds = array<i64: 128, 128>}, {transform_indices = @transform_1, window_bounds = array<i64: 128, 128>}, {transform_indices = @transform_2, window_bounds = array<i64: 1, 128>}, {transform_indices = @transform_3, window_bounds = array<i64: 128, 128>}]} {
    %c0_i32 = arith.constant 0 : i32
    %0 = arith.cmpi eq, %arg2, %c0_i32 : i32
    %1 = arith.extui %0 : i1 to i32
    %c0_i32_0 = arith.constant 0 : i32
    %2 = arith.cmpi ne, %1, %c0_i32_0 : i32
    scf.if %2 {
      %cst_10 = arith.constant 0.000000e+00 : f32
      %12 = vector.broadcast %cst_10 : f32 to vector<128x128xf32>
      %c0_11 = arith.constant 0 : index
      %c0_12 = arith.constant 0 : index
      %13 = vector.load %arg7[%c0_11, %c0_12] : memref<128x128xf32, #tpu.memory_space<vmem>>, vector<128x128xf32>
      tpu.vector_store %arg7[%c0_11, %c0_12], %12 {strides = array<i32>} : memref<128x128xf32, #tpu.memory_space<vmem>>, vector<128x128xf32>,
    } else {
    }
    %c0 = arith.constant 0 : index
    %c0_1 = arith.constant 0 : index
    %3 = vector.load %arg7[%c0, %c0_1] : memref<128x128xf32, #tpu.memory_space<vmem>>, vector<128x128xf32>
    %c0_2 = arith.constant 0 : index
    %c0_3 = arith.constant 0 : index
    %4 = vector.load %arg3[%c0_2, %c0_3] : memref<128x128xbf16, #tpu.memory_space<vmem>>, vector<128x128xbf16>
    %c0_4 = arith.constant 0 : index
    %c0_5 = arith.constant 0 : index
    %5 = vector.load %arg4[%c0_4, %c0_5] : memref<128x128xbf16, #tpu.memory_space<vmem>>, vector<128x128xbf16>
    %cst = arith.constant dense<0.000000e+00> : vector<128x128xf32>
    %6 = tpu.matmul %4, %5, %cst {dimension_numbers = #tpu.dot_dimension_numbers<[1], [0], [0], [1], [0, 0, 1, 1], [], []>} : vector<128x128xbf16>, vector<128x128xbf16>, vector<128x128xf32> -> vector<128x128xf32>
    %7 = arith.addf %3, %6 : vector<128x128xf32>
    %c0_6 = arith.constant 0 : index
    %c0_7 = arith.constant 0 : index
    %8 = vector.load %arg7[%c0_6, %c0_7] : memref<128x128xf32, #tpu.memory_space<vmem>>, vector<128x128xf32>
    tpu.vector_store %arg7[%c0_6, %c0_7], %7 {strides = array<i32>} : memref<128x128xf32, #tpu.memory_space<vmem>>, vector<128x128xf32>,
    %c0_i32_8 = arith.constant 0 : i32
    %9 = arith.cmpi eq, %arg2, %c0_i32_8 : i32
    %10 = arith.extui %9 : i1 to i32
    %c0_i32_9 = arith.constant 0 : i32
    %11 = arith.cmpi ne, %10, %c0_i32_9 : i32
    scf.if %11 {
      %c0_10 = arith.constant 0 : index
      %c0_11 = arith.constant 0 : index
      %12 = vector.load %arg7[%c0_10, %c0_11] : memref<128x128xf32, #tpu.memory_space<vmem>>, vector<128x128xf32>
      %c0_12 = arith.constant 0 : index
      %c0_13 = arith.constant 0 : index
      %13 = vector.load %arg5[%c0_12, %c0_13] : memref<1x128xf32, #tpu.memory_space<vmem>>, vector<1x128xf32>
      %14 = vector.broadcast %13 : vector<1x128xf32> to vector<128x128xf32>
      %15 = arith.addf %12, %14 : vector<128x128xf32>
      %cst_14 = arith.constant 0.000000e+00 : f32
      %16 = vector.broadcast %cst_14 : f32 to vector<128x128xf32>
      %17 = arith.maximumf %15, %16 : vector<128x128xf32>
      %c0_15 = arith.constant 0 : index
      %c0_16 = arith.constant 0 : index
      %18 = vector.load %arg6[%c0_15, %c0_16] : memref<128x128xf32, #tpu.memory_space<vmem>>, vector<128x128xf32>
      tpu.vector_store %arg6[%c0_15, %c0_16], %17 {strides = array<i32>} : memref<128x128xf32, #tpu.memory_space<vmem>>, vector<128x128xf32>,
    } else {
    }
    return
  }
  func.func @transform_0(%arg0: i32, %arg1: i32, %arg2: i32) -> (i32, i32) {
    %c0_i32 = arith.constant 0 : i32
    return %arg1, %arg2 : i32, i32
  }
  func.func @transform_1(%arg0: i32, %arg1: i32, %arg2: i32) -> (i32, i32) {
    %c0_i32 = arith.constant 0 : i32
    return %arg2, %arg0 : i32, i32
  }
  func.func @transform_2(%arg0: i32, %arg1: i32, %arg2: i32) -> (i32, i32) {
    %c0_i32 = arith.constant 0 : i32
    %c0_i32_0 = arith.constant 0 : i32
    return %c0_i32, %arg0 : i32, i32
  }
  func.func @transform_3(%arg0: i32, %arg1: i32, %arg2: i32) -> (i32, i32) {
    %c0_i32 = arith.constant 0 : i32
    return %arg1, %arg0 : i32, i32
  }
}

module attributes {stable_mosaic.version = 11 : i64} {
  func.func @_matmul_bias_relu_kernel(%arg0: i32, %arg1: i32, %arg2: i32, %arg3: memref<32x128xbf16, #tpu.memory_space<vmem>>, %arg4: memref<128x128xbf16, #tpu.memory_space<vmem>>, %arg5: memref<1x128xf32, #tpu.memory_space<vmem>>, %arg6: memref<32x128xf32, #tpu.memory_space<vmem>>, %arg7: memref<32x128xf32, #tpu.memory_space<vmem>>) attributes {dimension_semantics = [#tpu.dimension_semantics<parallel>, #tpu.dimension_semantics<parallel>, #tpu.dimension_semantics<arbitrary>], iteration_bounds = array<i64: 1, 1, 1>, scalar_prefetch = 0 : i64, scratch_operands = 1 : i64, tpu.core_type = #tpu.core_type<tc>, window_params = [{transform_indices = @transform_0, window_bounds = array<i64: 32, 128>}, {transform_indices = @transform_1, window_bounds = array<i64: 128, 128>}, {transform_indices = @transform_2, window_bounds = array<i64: 1, 128>}, {transform_indices = @transform_3, window_bounds = array<i64: 32, 128>}]} {
    %c0_i32 = arith.constant 0 : i32
    %0 = arith.cmpi eq, %arg2, %c0_i32 : i32
    %1 = arith.extui %0 : i1 to i32
    %c0_i32_0 = arith.constant 0 : i32
    %2 = arith.cmpi ne, %1, %c0_i32_0 : i32
    scf.if %2 {
      %cst_10 = arith.constant 0.000000e+00 : f32
      %12 = vector.broadcast %cst_10 : f32 to vector<32x128xf32>
      %c0_11 = arith.constant 0 : index
      %c0_12 = arith.constant 0 : index
      %13 = vector.load %arg7[%c0_11, %c0_12] : memref<32x128xf32, #tpu.memory_space<vmem>>, vector<32x128xf32>
      tpu.vector_store %arg7[%c0_11, %c0_12], %12 {strides = array<i32>} : memref<32x128xf32, #tpu.memory_space<vmem>>, vector<32x128xf32>,
    } else {
    }
    %c0 = arith.constant 0 : index
    %c0_1 = arith.constant 0 : index
    %3 = vector.load %arg7[%c0, %c0_1] : memref<32x128xf32, #tpu.memory_space<vmem>>, vector<32x128xf32>
    %c0_2 = arith.constant 0 : index
    %c0_3 = arith.constant 0 : index
    %4 = vector.load %arg3[%c0_2, %c0_3] : memref<32x128xbf16, #tpu.memory_space<vmem>>, vector<32x128xbf16>
    %c0_4 = arith.constant 0 : index
    %c0_5 = arith.constant 0 : index
    %5 = vector.load %arg4[%c0_4, %c0_5] : memref<128x128xbf16, #tpu.memory_space<vmem>>, vector<128x128xbf16>
    %cst = arith.constant dense<0.000000e+00> : vector<32x128xf32>
    %6 = tpu.matmul %4, %5, %cst {dimension_numbers = #tpu.dot_dimension_numbers<[1], [0], [0], [1], [0, 0, 1, 1], [], []>} : vector<32x128xbf16>, vector<128x128xbf16>, vector<32x128xf32> -> vector<32x128xf32>
    %7 = arith.addf %3, %6 : vector<32x128xf32>
    %c0_6 = arith.constant 0 : index
    %c0_7 = arith.constant 0 : index
    %8 = vector.load %arg7[%c0_6, %c0_7] : memref<32x128xf32, #tpu.memory_space<vmem>>, vector<32x128xf32>
    tpu.vector_store %arg7[%c0_6, %c0_7], %7 {strides = array<i32>} : memref<32x128xf32, #tpu.memory_space<vmem>>, vector<32x128xf32>,
    %c0_i32_8 = arith.constant 0 : i32
    %9 = arith.cmpi eq, %arg2, %c0_i32_8 : i32
    %10 = arith.extui %9 : i1 to i32
    %c0_i32_9 = arith.constant 0 : i32
    %11 = arith.cmpi ne, %10, %c0_i32_9 : i32
    scf.if %11 {
      %c0_10 = arith.constant 0 : index
      %c0_11 = arith.constant 0 : index
      %12 = vector.load %arg7[%c0_10, %c0_11] : memref<32x128xf32, #tpu.memory_space<vmem>>, vector<32x128xf32>
      %c0_12 = arith.constant 0 : index
      %c0_13 = arith.constant 0 : index
      %13 = vector.load %arg5[%c0_12, %c0_13] : memref<1x128xf32, #tpu.memory_space<vmem>>, vector<1x128xf32>
      %14 = vector.broadcast %13 : vector<1x128xf32> to vector<32x128xf32>
      %15 = arith.addf %12, %14 : vector<32x128xf32>
      %cst_14 = arith.constant 0.000000e+00 : f32
      %16 = vector.broadcast %cst_14 : f32 to vector<32x128xf32>
      %17 = arith.maximumf %15, %16 : vector<32x128xf32>
      %c0_15 = arith.constant 0 : index
      %c0_16 = arith.constant 0 : index
      %18 = vector.load %arg6[%c0_15, %c0_16] : memref<32x128xf32, #tpu.memory_space<vmem>>, vector<32x128xf32>
      tpu.vector_store %arg6[%c0_15, %c0_16], %17 {strides = array<i32>} : memref<32x128xf32, #tpu.memory_space<vmem>>, vector<32x128xf32>,
    } else {
    }
    return
  }
  func.func @transform_0(%arg0: i32, %arg1: i32, %arg2: i32) -> (i32, i32) {
    %c0_i32 = arith.constant 0 : i32
    return %arg1, %arg2 : i32, i32
  }
  func.func @transform_1(%arg0: i32, %arg1: i32, %arg2: i32) -> (i32, i32) {
    %c0_i32 = arith.constant 0 : i32
    return %arg2, %arg0 : i32, i32
  }
  func.func @transform_2(%arg0: i32, %arg1: i32, %arg2: i32) -> (i32, i32) {
    %c0_i32 = arith.constant 0 : i32
    %c0_i32_0 = arith.constant 0 : i32
    return %c0_i32, %arg0 : i32, i32
  }
  func.func @transform_3(%arg0: i32, %arg1: i32, %arg2: i32) -> (i32, i32) {
    %c0_i32 = arith.constant 0 : i32
    return %arg1, %arg0 : i32, i32
  }
}

module attributes {stable_mosaic.version = 11 : i64} {
  func.func @_matmul_bias_relu_kernel(%arg0: i32, %arg1: i32, %arg2: i32, %arg3: memref<8x256xbf16, #tpu.memory_space<vmem>>, %arg4: memref<256x128xbf16, #tpu.memory_space<vmem>>, %arg5: memref<1x128xf32, #tpu.memory_space<vmem>>, %arg6: memref<8x128xf32, #tpu.memory_space<vmem>>, %arg7: memref<8x128xf32, #tpu.memory_space<vmem>>) attributes {dimension_semantics = [#tpu.dimension_semantics<parallel>, #tpu.dimension_semantics<parallel>, #tpu.dimension_semantics<arbitrary>], iteration_bounds = array<i64: 1, 1, 1>, scalar_prefetch = 0 : i64, scratch_operands = 1 : i64, tpu.core_type = #tpu.core_type<tc>, window_params = [{transform_indices = @transform_0, window_bounds = array<i64: 8, 256>}, {transform_indices = @transform_1, window_bounds = array<i64: 256, 128>}, {transform_indices = @transform_2, window_bounds = array<i64: 1, 128>}, {transform_indices = @transform_3, window_bounds = array<i64: 8, 128>}]} {
    %c0_i32 = arith.constant 0 : i32
    %0 = arith.cmpi eq, %arg2, %c0_i32 : i32
    %1 = arith.extui %0 : i1 to i32
    %c0_i32_0 = arith.constant 0 : i32
    %2 = arith.cmpi ne, %1, %c0_i32_0 : i32
    scf.if %2 {
      %cst_10 = arith.constant 0.000000e+00 : f32
      %12 = vector.broadcast %cst_10 : f32 to vector<8x128xf32>
      %c0_11 = arith.constant 0 : index
      %c0_12 = arith.constant 0 : index
      %13 = vector.load %arg7[%c0_11, %c0_12] : memref<8x128xf32, #tpu.memory_space<vmem>>, vector<8x128xf32>
      tpu.vector_store %arg7[%c0_11, %c0_12], %12 {strides = array<i32>} : memref<8x128xf32, #tpu.memory_space<vmem>>, vector<8x128xf32>,
    } else {
    }
    %c0 = arith.constant 0 : index
    %c0_1 = arith.constant 0 : index
    %3 = vector.load %arg7[%c0, %c0_1] : memref<8x128xf32, #tpu.memory_space<vmem>>, vector<8x128xf32>
    %c0_2 = arith.constant 0 : index
    %c0_3 = arith.constant 0 : index
    %4 = vector.load %arg3[%c0_2, %c0_3] : memref<8x256xbf16, #tpu.memory_space<vmem>>, vector<8x256xbf16>
    %c0_4 = arith.constant 0 : index
    %c0_5 = arith.constant 0 : index
    %5 = vector.load %arg4[%c0_4, %c0_5] : memref<256x128xbf16, #tpu.memory_space<vmem>>, vector<256x128xbf16>
    %cst = arith.constant dense<0.000000e+00> : vector<8x128xf32>
    %6 = tpu.matmul %4, %5, %cst {dimension_numbers = #tpu.dot_dimension_numbers<[1], [0], [0], [1], [0, 0, 1, 1], [], []>} : vector<8x256xbf16>, vector<256x128xbf16>, vector<8x128xf32> -> vector<8x128xf32>
    %7 = arith.addf %3, %6 : vector<8x128xf32>
    %c0_6 = arith.constant 0 : index
    %c0_7 = arith.constant 0 : index
    %8 = vector.load %arg7[%c0_6, %c0_7] : memref<8x128xf32, #tpu.memory_space<vmem>>, vector<8x128xf32>
    tpu.vector_store %arg7[%c0_6, %c0_7], %7 {strides = array<i32>} : memref<8x128xf32, #tpu.memory_space<vmem>>, vector<8x128xf32>,
    %c0_i32_8 = arith.constant 0 : i32
    %9 = arith.cmpi eq, %arg2, %c0_i32_8 : i32
    %10 = arith.extui %9 : i1 to i32
    %c0_i32_9 = arith.constant 0 : i32
    %11 = arith.cmpi ne, %10, %c0_i32_9 : i32
    scf.if %11 {
      %c0_10 = arith.constant 0 : index
      %c0_11 = arith.constant 0 : index
      %12 = vector.load %arg7[%c0_10, %c0_11] : memref<8x128xf32, #tpu.memory_space<vmem>>, vector<8x128xf32>
      %c0_12 = arith.constant 0 : index
      %c0_13 = arith.constant 0 : index
      %13 = vector.load %arg5[%c0_12, %c0_13] : memref<1x128xf32, #tpu.memory_space<vmem>>, vector<1x128xf32>
      %14 = vector.broadcast %13 : vector<1x128xf32> to vector<8x128xf32>
      %15 = arith.addf %12, %14 : vector<8x128xf32>
      %cst_14 = arith.constant 0.000000e+00 : f32
      %16 = vector.broadcast %cst_14 : f32 to vector<8x128xf32>
      %17 = arith.maximumf %15, %16 : vector<8x128xf32>
      %c0_15 = arith.constant 0 : index
      %c0_16 = arith.constant 0 : index
      %18 = vector.load %arg6[%c0_15, %c0_16] : memref<8x128xf32, #tpu.memory_space<vmem>>, vector<8x128xf32>
      tpu.vector_store %arg6[%c0_15, %c0_16], %17 {strides = array<i32>} : memref<8x128xf32, #tpu.memory_space<vmem>>, vector<8x128xf32>,
    } else {
    }
    return
  }
  func.func @transform_0(%arg0: i32, %arg1: i32, %arg2: i32) -> (i32, i32) {
    %c0_i32 = arith.constant 0 : i32
    return %arg1, %arg2 : i32, i32
  }
  func.func @transform_1(%arg0: i32, %arg1: i32, %arg2: i32) -> (i32, i32) {
    %c0_i32 = arith.constant 0 : i32
    return %arg2, %arg0 : i32, i32
  }
  func.func @transform_2(%arg0: i32, %arg1: i32, %arg2: i32) -> (i32, i32) {
    %c0_i32 = arith.constant 0 : i32
    %c0_i32_0 = arith.constant 0 : i32
    return %c0_i32, %arg0 : i32, i32
  }
  func.func @transform_3(%arg0: i32, %arg1: i32, %arg2: i32) -> (i32, i32) {
    %c0_i32 = arith.constant 0 : i32
    return %arg1, %arg0 : i32, i32
  }
}

module attributes {stable_mosaic.version = 11 : i64} {
  func.func @_matmul_bias_relu_kernel(%arg0: i32, %arg1: i32, %arg2: i32, %arg3: memref<8x384xbf16, #tpu.memory_space<vmem>>, %arg4: memref<384x128xbf16, #tpu.memory_space<vmem>>, %arg5: memref<1x128xf32, #tpu.memory_space<vmem>>, %arg6: memref<8x128xf32, #tpu.memory_space<vmem>>, %arg7: memref<8x128xf32, #tpu.memory_space<vmem>>) attributes {dimension_semantics = [#tpu.dimension_semantics<parallel>, #tpu.dimension_semantics<parallel>, #tpu.dimension_semantics<arbitrary>], iteration_bounds = array<i64: 1, 1, 1>, scalar_prefetch = 0 : i64, scratch_operands = 1 : i64, tpu.core_type = #tpu.core_type<tc>, window_params = [{transform_indices = @transform_0, window_bounds = array<i64: 8, 384>}, {transform_indices = @transform_1, window_bounds = array<i64: 384, 128>}, {transform_indices = @transform_2, window_bounds = array<i64: 1, 128>}, {transform_indices = @transform_3, window_bounds = array<i64: 8, 128>}]} {
    %c0_i32 = arith.constant 0 : i32
    %0 = arith.cmpi eq, %arg2, %c0_i32 : i32
    %1 = arith.extui %0 : i1 to i32
    %c0_i32_0 = arith.constant 0 : i32
    %2 = arith.cmpi ne, %1, %c0_i32_0 : i32
    scf.if %2 {
      %cst_10 = arith.constant 0.000000e+00 : f32
      %12 = vector.broadcast %cst_10 : f32 to vector<8x128xf32>
      %c0_11 = arith.constant 0 : index
      %c0_12 = arith.constant 0 : index
      %13 = vector.load %arg7[%c0_11, %c0_12] : memref<8x128xf32, #tpu.memory_space<vmem>>, vector<8x128xf32>
      tpu.vector_store %arg7[%c0_11, %c0_12], %12 {strides = array<i32>} : memref<8x128xf32, #tpu.memory_space<vmem>>, vector<8x128xf32>,
    } else {
    }
    %c0 = arith.constant 0 : index
    %c0_1 = arith.constant 0 : index
    %3 = vector.load %arg7[%c0, %c0_1] : memref<8x128xf32, #tpu.memory_space<vmem>>, vector<8x128xf32>
    %c0_2 = arith.constant 0 : index
    %c0_3 = arith.constant 0 : index
    %4 = vector.load %arg3[%c0_2, %c0_3] : memref<8x384xbf16, #tpu.memory_space<vmem>>, vector<8x384xbf16>
    %c0_4 = arith.constant 0 : index
    %c0_5 = arith.constant 0 : index
    %5 = vector.load %arg4[%c0_4, %c0_5] : memref<384x128xbf16, #tpu.memory_space<vmem>>, vector<384x128xbf16>
    %cst = arith.constant dense<0.000000e+00> : vector<8x128xf32>
    %6 = tpu.matmul %4, %5, %cst {dimension_numbers = #tpu.dot_dimension_numbers<[1], [0], [0], [1], [0, 0, 1, 1], [], []>} : vector<8x384xbf16>, vector<384x128xbf16>, vector<8x128xf32> -> vector<8x128xf32>
    %7 = arith.addf %3, %6 : vector<8x128xf32>
    %c0_6 = arith.constant 0 : index
    %c0_7 = arith.constant 0 : index
    %8 = vector.load %arg7[%c0_6, %c0_7] : memref<8x128xf32, #tpu.memory_space<vmem>>, vector<8x128xf32>
    tpu.vector_store %arg7[%c0_6, %c0_7], %7 {strides = array<i32>} : memref<8x128xf32, #tpu.memory_space<vmem>>, vector<8x128xf32>,
    %c0_i32_8 = arith.constant 0 : i32
    %9 = arith.cmpi eq, %arg2, %c0_i32_8 : i32
    %10 = arith.extui %9 : i1 to i32
    %c0_i32_9 = arith.constant 0 : i32
    %11 = arith.cmpi ne, %10, %c0_i32_9 : i32
    scf.if %11 {
      %c0_10 = arith.constant 0 : index
      %c0_11 = arith.constant 0 : index
      %12 = vector.load %arg7[%c0_10, %c0_11] : memref<8x128xf32, #tpu.memory_space<vmem>>, vector<8x128xf32>
      %c0_12 = arith.constant 0 : index
      %c0_13 = arith.constant 0 : index
      %13 = vector.load %arg5[%c0_12, %c0_13] : memref<1x128xf32, #tpu.memory_space<vmem>>, vector<1x128xf32>
      %14 = vector.broadcast %13 : vector<1x128xf32> to vector<8x128xf32>
      %15 = arith.addf %12, %14 : vector<8x128xf32>
      %cst_14 = arith.constant 0.000000e+00 : f32
      %16 = vector.broadcast %cst_14 : f32 to vector<8x128xf32>
      %17 = arith.maximumf %15, %16 : vector<8x128xf32>
      %c0_15 = arith.constant 0 : index
      %c0_16 = arith.constant 0 : index
      %18 = vector.load %arg6[%c0_15, %c0_16] : memref<8x128xf32, #tpu.memory_space<vmem>>, vector<8x128xf32>
      tpu.vector_store %arg6[%c0_15, %c0_16], %17 {strides = array<i32>} : memref<8x128xf32, #tpu.memory_space<vmem>>, vector<8x128xf32>,
    } else {
    }
    return
  }
  func.func @transform_0(%arg0: i32, %arg1: i32, %arg2: i32) -> (i32, i32) {
    %c0_i32 = arith.constant 0 : i32
    return %arg1, %arg2 : i32, i32
  }
  func.func @transform_1(%arg0: i32, %arg1: i32, %arg2: i32) -> (i32, i32) {
    %c0_i32 = arith.constant 0 : i32
    return %arg2, %arg0 : i32, i32
  }
  func.func @transform_2(%arg0: i32, %arg1: i32, %arg2: i32) -> (i32, i32) {
    %c0_i32 = arith.constant 0 : i32
    %c0_i32_0 = arith.constant 0 : i32
    return %c0_i32, %arg0 : i32, i32
  }
  func.func @transform_3(%arg0: i32, %arg1: i32, %arg2: i32) -> (i32, i32) {
    %c0_i32 = arith.constant 0 : i32
    return %arg1, %arg0 : i32, i32
  }
}

</mosaic_0001>

<bundles_post_ra>
// kernel: _forward_impl.4
= control target key start
LH: loop header
LB: loop body
LE: loop exit
PB: predicated region body
PF: predicated region fallthrough
CT: control target
= control target key end

     0   :  { %s602_s1 = inlined_call_operand.vmem [shape: bf16[128,128], index: 1, kind: input, shape index: {}]   ;;  %s603_s0 = inlined_call_operand.vmem [shape: bf16[128,128], index: 0, kind: input, shape index: {}]   ;;  %s604_s2 = inlined_call_operand.vmem [shape: f32[1,128], index: 2, kind: input, shape index: {}]   ;;  %s605_s3 = inlined_call_operand.vmem [shape: f32[128,128], index: 3, kind: output, shape index: {}]  }
   0x1   :  { %v467_v0 = vld [vmem:[%s602_s1 + $0x38] sm:$0xff]   ;;  %v468_v1 = vld [vmem:[%s602_s1 + $0x30] sm:$0xff]   ;;  %v469_v2 = vld [vmem:[%s602_s1 + $0x28] sm:$0xff]  }
   0x2   :  { %419 = vmatprep.subr.bf16.mxu0 %v467_v0  ;;  %451 = vmatprep.subr.bf16.mxu1 %v467_v0  ;;  %v470_v3 = vld [vmem:[%s602_s1 + $0x20] sm:$0xff]   ;;  %v471_v6 = vld [vmem:[%s602_s1 + $0x18] sm:$0xff]   ;;  %v472_v7 = vld [vmem:[%s602_s1 + $0x10] sm:$0xff]  }
   0x3   :  { %420 = vmatpush3.bf16.msra.mxu0 %v467_v0  ;;  %459 = vmatpush3.bf16.msra.mxu1 %v467_v0  ;;  %v475_v4 = vld [vmem:[%s603_s0] sm:$0xff]   ;;  %v473_v8 = vld [vmem:[%s602_s1 + $0x8] sm:$0xff]   ;;  %v479_v12 = vld [vmem:[%s603_s0 + $0x10] sm:$0xff]  }
   0x4   :  { %421 = vmatprep.subr.bf16.mxu0 %v468_v1  ;;  %452 = vmatprep.subr.bf16.mxu1 %v468_v1  ;;  %v476_v5 = vld [vmem:[%s603_s0 + $0x20] sm:$0xff]   ;;  %v477_v10 = vld [vmem:[%s603_s0 + $0x8] sm:$0xff]   ;;  %v480_v13 = vld [vmem:[%s603_s0 + $0x30] sm:$0xff]  }
   0x5   :  { %435 = vmatprep.mubr.bf16.mxu0 %v475_v4  ;;  %443 = vmatprep.mubr.bf16.mxu1 %v476_v5  ;;  %v474_v9 = vld [vmem:[%s602_s1] sm:$0xff]   ;;  %v478_v11 = vld [vmem:[%s603_s0 + $0x28] sm:$0xff]   ;;  %v481_v14 = vld [vmem:[%s603_s0 + $0x18] sm:$0xff]  }
   0x6   :  { %v482_v15 = vld [vmem:[%s603_s0 + $0x38] sm:$0xff]   ;;  %v402_v16 = vld [vmem:[%s604_s2] ss:$0 sm:$0xff] }
   0x7   :  { %422 = vmatpush3.bf16.msra.mxu0 %v468_v1  ;;  %460 = vmatpush3.bf16.msra.mxu1 %v468_v1 }
   0x8   :  { %423 = vmatprep.subr.bf16.mxu0 %v469_v2  ;;  %453 = vmatprep.subr.bf16.mxu1 %v469_v2 }
   0xb   :  { %424 = vmatpush3.bf16.msra.mxu0 %v469_v2  ;;  %461 = vmatpush3.bf16.msra.mxu1 %v469_v2 }
   0xc   :  { %425 = vmatprep.subr.bf16.mxu0 %v470_v3  ;;  %454 = vmatprep.subr.bf16.mxu1 %v470_v3 }
   0xf   :  { %426 = vmatpush3.bf16.msra.mxu0 %v470_v3  ;;  %462 = vmatpush3.bf16.msra.mxu1 %v470_v3 }
  0x10   :  { %427 = vmatprep.subr.bf16.mxu0 %v471_v6  ;;  %455 = vmatprep.subr.bf16.mxu1 %v471_v6 }
  0x13   :  { %428 = vmatpush3.bf16.msra.mxu0 %v471_v6  ;;  %463 = vmatpush3.bf16.msra.mxu1 %v471_v6 }
  0x14   :  { %429 = vmatprep.subr.bf16.mxu0 %v472_v7  ;;  %456 = vmatprep.subr.bf16.mxu1 %v472_v7 }
  0x17   :  { %430 = vmatpush3.bf16.msra.mxu0 %v472_v7  ;;  %464 = vmatpush3.bf16.msra.mxu1 %v472_v7 }
  0x18   :  { %431 = vmatprep.subr.bf16.mxu0 %v473_v8  ;;  %457 = vmatprep.subr.bf16.mxu1 %v473_v8 }
  0x1b   :  { %432 = vmatpush3.bf16.msra.mxu0 %v473_v8  ;;  %465 = vmatpush3.bf16.msra.mxu1 %v473_v8 }
  0x1c   :  { %433 = vmatprep.subr.bf16.mxu0 %v474_v9  ;;  %458 = vmatprep.subr.bf16.mxu1 %v474_v9 }
  0x1f   :  { %434 = vmatpush3.bf16.msra.mxu0 %v474_v9  ;;  %466 = vmatpush3.bf16.msra.mxu1 %v474_v9 }
  0x22   :  { %436 = vmatmul.mubr.bf16.vlgmr.msra.gmra.mxu0 %v477_v10  ;;  %444 = vmatmul.mubr.bf16.vlgmr.msra.gmra.mxu1 %v478_v11 }
  0x23   :  { %439 = vmatprep.mubr.bf16.mxu0 %v479_v12  ;;  %447 = vmatprep.mubr.bf16.mxu1 %v480_v13 }
  0x2a   :  { %440 = vmatmul.mubr.bf16.gmra.mxu0 %v481_v14  ;;  %448 = vmatmul.mubr.bf16.gmra.mxu1 %v482_v15 }
  0xe2   :  { %v437_v17 = vpop.f32.mrf.mxu0  ;;  %v445_v18 = vpop.f32.mrf.mxu1 }
  0xe3   :  { %v336_v19 = vadd.f32 %v437_v17, %v402_v16  ;;  %v344_v20 = vadd.f32 %v445_v18, %v402_v16 }
  0xe4   :  { %v213_v21 = vpop.f32.mrf.mxu0  ;;  %v245_v22 = vpop.f32.mrf.mxu1 }
  0xe5   :  { %v352_v23 = vmax.f32 %v336_v19, 0.0  ;;  %v360_v24 = vmax.f32 %v344_v20, 0.0  ;;  %v334_v25 = vadd.f32 %v402_v16, %v213_v21  ;;  %v342_v26 = vadd.f32 %v402_v16, %v245_v22 }
  0xe6   :  { %v438_v27 = vpop.f32.mrf.mxu0  ;;  %v446_v28 = vpop.f32.mrf.mxu1 }
  0xe7   :  { %368 = vst [vmem:[%s605_s3 + $0x10] sm:$0xff] %v352_v23  ;;  %376 = vst [vmem:[%s605_s3 + $0x50] sm:$0xff] %v360_v24  ;;  %v350_v29 = vmax.f32 %v334_v25, 0.0  ;;  %v358_v30 = vmax.f32 %v342_v26, 0.0  ;;  %v337_v31 = vadd.f32 %v438_v27, %v402_v16  ;;  %v345_v32 = vadd.f32 %v446_v28, %v402_v16 }
  0xe8   :  { %v216_v33 = vpop.f32.mrf.mxu0  ;;  %v248_v34 = vpop.f32.mrf.mxu1 }
  0xe9   :  { %366 = vst [vmem:[%s605_s3] sm:$0xff] %v350_v29  ;;  %374 = vst [vmem:[%s605_s3 + $0x40] sm:$0xff] %v358_v30  ;;  %v353_v35 = vmax.f32 %v337_v31, 0.0  ;;  %v361_v36 = vmax.f32 %v345_v32, 0.0  ;;  %v335_v37 = vadd.f32 %v402_v16, %v216_v33  ;;  %v343_v38 = vadd.f32 %v402_v16, %v248_v34 }
  0xea   :  { %v441_v39 = vpop.f32.mrf.mxu0  ;;  %v449_v40 = vpop.f32.mrf.mxu1 }
  0xeb   :  { %369 = vst [vmem:[%s605_s3 + $0x18] sm:$0xff] %v353_v35  ;;  %377 = vst [vmem:[%s605_s3 + $0x58] sm:$0xff] %v361_v36  ;;  %v351_v41 = vmax.f32 %v335_v37, 0.0  ;;  %v359_v42 = vmax.f32 %v343_v38, 0.0  ;;  %v340_v43 = vadd.f32 %v441_v39, %v402_v16  ;;  %v348_v44 = vadd.f32 %v449_v40, %v402_v16 }
  0xec   :  { %v229_v45 = vpop.f32.mrf.mxu0  ;;  %v261_v46 = vpop.f32.mrf.mxu1 }
  0xed   :  { %367 = vst [vmem:[%s605_s3 + $0x8] sm:$0xff] %v351_v41  ;;  %375 = vst [vmem:[%s605_s3 + $0x48] sm:$0xff] %v359_v42  ;;  %v356_v47 = vmax.f32 %v340_v43, 0.0  ;;  %v364_v48 = vmax.f32 %v348_v44, 0.0  ;;  %v338_v49 = vadd.f32 %v402_v16, %v229_v45  ;;  %v346_v50 = vadd.f32 %v402_v16, %v261_v46 }
  0xee   :  { %v442_v51 = vpop.f32.mrf.mxu0  ;;  %v450_v52 = vpop.f32.mrf.mxu1 }
  0xef   :  { %372 = vst [vmem:[%s605_s3 + $0x30] sm:$0xff] %v356_v47  ;;  %380 = vst [vmem:[%s605_s3 + $0x70] sm:$0xff] %v364_v48  ;;  %v354_v53 = vmax.f32 %v338_v49, 0.0  ;;  %v362_v54 = vmax.f32 %v346_v50, 0.0  ;;  %v341_v55 = vadd.f32 %v442_v51, %v402_v16  ;;  %v349_v56 = vadd.f32 %v450_v52, %v402_v16 }
  0xf0   :  { %v232_v57 = vpop.f32.mrf.mxu0  ;;  %v264_v58 = vpop.f32.mrf.mxu1 }
  0xf1   :  { %370 = vst [vmem:[%s605_s3 + $0x20] sm:$0xff] %v354_v53  ;;  %378 = vst [vmem:[%s605_s3 + $0x60] sm:$0xff] %v362_v54  ;;  %v357_v59 = vmax.f32 %v341_v55, 0.0  ;;  %v365_v60 = vmax.f32 %v349_v56, 0.0  ;;  %v339_v61 = vadd.f32 %v402_v16, %v232_v57  ;;  %v347_v62 = vadd.f32 %v402_v16, %v264_v58 }
  0xf3   :  { %373 = vst [vmem:[%s605_s3 + $0x38] sm:$0xff] %v357_v59  ;;  %381 = vst [vmem:[%s605_s3 + $0x78] sm:$0xff] %v365_v60  ;;  %v355_v63 = vmax.f32 %v339_v61, 0.0  ;;  %v363_v0 = vmax.f32 %v347_v62, 0.0 }
  0xf5   :  { %371 = vst [vmem:[%s605_s3 + $0x28] sm:$0xff] %v355_v63  ;;  %379 = vst [vmem:[%s605_s3 + $0x68] sm:$0xff] %v363_v0 }

// kernel: _forward_impl.5
= control target key start
LH: loop header
LB: loop body
LE: loop exit
PB: predicated region body
PF: predicated region fallthrough
CT: control target
= control target key end

     0   :  { %s310_s1 = inlined_call_operand.vmem [shape: bf16[128,128], index: 1, kind: input, shape index: {}]   ;;  %s311_s0 = inlined_call_operand.vmem [shape: bf16[32,128], index: 0, kind: input, shape index: {}]   ;;  %s312_s2 = inlined_call_operand.vmem [shape: f32[1,128], index: 2, kind: input, shape index: {}]   ;;  %s313_s3 = inlined_call_operand.vmem [shape: f32[32,128], index: 3, kind: output, shape index: {}]  }
   0x1   :  { %v235_v0 = vld [vmem:[%s310_s1 + $0x38] sm:$0xff]   ;;  %v236_v1 = vld [vmem:[%s310_s1 + $0x30] sm:$0xff]   ;;  %v237_v2 = vld [vmem:[%s310_s1 + $0x28] sm:$0xff]  }
   0x2   :  { %215 = vmatprep.subr.bf16.mxu0 %v235_v0  ;;  %v238_v3 = vld [vmem:[%s310_s1 + $0x20] sm:$0xff]   ;;  %v239_v5 = vld [vmem:[%s310_s1 + $0x18] sm:$0xff]   ;;  %v240_v6 = vld [vmem:[%s310_s1 + $0x10] sm:$0xff]  }
   0x3   :  { %216 = vmatpush3.bf16.msra.mxu0 %v235_v0  ;;  %v243_v4 = vld [vmem:[%s311_s0] sm:$0xff]   ;;  %v241_v7 = vld [vmem:[%s310_s1 + $0x8] sm:$0xff]  }
   0x4   :  { %217 = vmatprep.subr.bf16.mxu0 %v236_v1  ;;  %231 = vmatprep.mubr.bf16.mxu0 %v243_v4  ;;  %v242_v8 = vld [vmem:[%s310_s1] sm:$0xff]   ;;  %v244_v9 = vld [vmem:[%s311_s0 + $0x8] sm:$0xff]  }
   0x5   :  { %v204_v10 = vld [vmem:[%s312_s2] ss:$0 sm:$0xff] }
   0x7   :  { %218 = vmatpush3.bf16.msra.mxu0 %v236_v1 }
   0x8   :  { %219 = vmatprep.subr.bf16.mxu0 %v237_v2 }
   0xb   :  { %220 = vmatpush3.bf16.msra.mxu0 %v237_v2 }
   0xc   :  { %221 = vmatprep.subr.bf16.mxu0 %v238_v3 }
   0xf   :  { %222 = vmatpush3.bf16.msra.mxu0 %v238_v3 }
  0x10   :  { %223 = vmatprep.subr.bf16.mxu0 %v239_v5 }
  0x13   :  { %224 = vmatpush3.bf16.msra.mxu0 %v239_v5 }
  0x14   :  { %225 = vmatprep.subr.bf16.mxu0 %v240_v6 }
  0x17   :  { %226 = vmatpush3.bf16.msra.mxu0 %v240_v6 }
  0x18   :  { %227 = vmatprep.subr.bf16.mxu0 %v241_v7 }
  0x1b   :  { %228 = vmatpush3.bf16.msra.mxu0 %v241_v7 }
  0x1c   :  { %229 = vmatprep.subr.bf16.mxu0 %v242_v8 }
  0x1f   :  { %230 = vmatpush3.bf16.msra.mxu0 %v242_v8 }
  0x22   :  { %232 = vmatmul.mubr.bf16.vlgmr.msra.gmra.mxu0 %v244_v9 }
  0xe2   :  { %v233_v11 = vpop.f32.mrf.mxu0 }
  0xe3   :  { %v180_v12 = vadd.f32 %v233_v11, %v204_v10 }
  0xe4   :  { %v141_v13 = vpop.f32.mrf.mxu0 }
  0xe5   :  { %v184_v14 = vmax.f32 %v180_v12, 0.0  ;;  %v178_v15 = vadd.f32 %v204_v10, %v141_v13 }
  0xe6   :  { %v234_v16 = vpop.f32.mrf.mxu0 }
  0xe7   :  { %188 = vst [vmem:[%s313_s3 + $0x10] sm:$0xff] %v184_v14  ;;  %v182_v17 = vmax.f32 %v178_v15, 0.0  ;;  %v181_v18 = vadd.f32 %v234_v16, %v204_v10 }
  0xe8   :  { %v144_v19 = vpop.f32.mrf.mxu0 }
  0xe9   :  { %186 = vst [vmem:[%s313_s3] sm:$0xff] %v182_v17  ;;  %v185_v20 = vmax.f32 %v181_v18, 0.0  ;;  %v179_v21 = vadd.f32 %v204_v10, %v144_v19 }
  0xeb   :  { %189 = vst [vmem:[%s313_s3 + $0x18] sm:$0xff] %v185_v20  ;;  %v183_v22 = vmax.f32 %v179_v21, 0.0 }
  0xed   :  { %187 = vst [vmem:[%s313_s3 + $0x8] sm:$0xff] %v183_v22 }

// kernel: _forward_impl.6
= control target key start
LH: loop header
LB: loop body
LE: loop exit
PB: predicated region body
PF: predicated region fallthrough
CT: control target
= control target key end

     0   :  { %s353_s1 = inlined_call_operand.vmem [shape: bf16[256,128], index: 1, kind: input, shape index: {}]   ;;  %s354_s0 = inlined_call_operand.vmem [shape: bf16[8,256], index: 0, kind: input, shape index: {}]   ;;  %s355_s2 = inlined_call_operand.vmem [shape: f32[1,128], index: 2, kind: input, shape index: {}]   ;;  %s356_s3 = inlined_call_operand.vmem [shape: f32[8,128], index: 3, kind: output, shape index: {}]  }
   0x1   :  { %v258_v0 = vld [vmem:[%s353_s1 + $0x78] sm:$0xff]   ;;  %v260_v2 = vld [vmem:[%s353_s1 + $0x70] sm:$0xff]   ;;  %v262_v4 = vld [vmem:[%s353_s1 + $0x68] sm:$0xff]  }
   0x2   :  { %v259_v1 = vld [vmem:[%s353_s1 + $0x38] sm:$0xff]   ;;  %236 = vmatprep.subr.bf16.mxu0 %v258_v0  ;;  %v261_v3 = vld [vmem:[%s353_s1 + $0x30] sm:$0xff]   ;;  %v263_v5 = vld [vmem:[%s353_s1 + $0x28] sm:$0xff]  }
   0x3   :  { %237 = vmatpush3.bf16.msra.mxu0 %v259_v1  ;;  %v264_v6 = vld [vmem:[%s353_s1 + $0x60] sm:$0xff]   ;;  %v266_v8 = vld [vmem:[%s353_s1 + $0x58] sm:$0xff]   ;;  %v268_v10 = vld [vmem:[%s353_s1 + $0x50] sm:$0xff]  }
   0x4   :  { %238 = vmatprep.subr.bf16.mxu0 %v260_v2  ;;  %v265_v7 = vld [vmem:[%s353_s1 + $0x20] sm:$0xff]   ;;  %v267_v9 = vld [vmem:[%s353_s1 + $0x18] sm:$0xff]   ;;  %v269_v13 = vld [vmem:[%s353_s1 + $0x10] sm:$0xff]  }
   0x5   :  { %v21_v11 = vld [vmem:[%s354_s0] sm:$0xff]  ;;  %v270_v14 = vld [vmem:[%s353_s1 + $0x48] sm:$0xff]  }
   0x6   :  { %v218_v12 = vcombine.high %v21_v11, %v21_v11  ;;  %v271_v15 = vld [vmem:[%s353_s1 + $0x8] sm:$0xff]   ;;  %v272_v16 = vld [vmem:[%s353_s1 + $0x40] sm:$0xff]   ;;  %v217_v18 = vcombine.low %v21_v11, %v21_v11 }
   0x7   :  { %239 = vmatpush3.bf16.msra.mxu0 %v261_v3  ;;  %v273_v17 = vld [vmem:[%s353_s1] sm:$0xff]  }
   0x8   :  { %240 = vmatprep.subr.bf16.mxu0 %v262_v4  ;;  %189 = vmatprep.mubr.bf16.mxu0 %v218_v12  ;;  %v235_v21 = vld [vmem:[%s355_s2] ss:$0 sm:$0xff] }
   0xb   :  { %241 = vmatpush3.bf16.msra.mxu0 %v263_v5 }
   0xc   :  { %242 = vmatprep.subr.bf16.mxu0 %v264_v6 }
   0xf   :  { %243 = vmatpush3.bf16.msra.mxu0 %v265_v7 }
  0x10   :  { %244 = vmatprep.subr.bf16.mxu0 %v266_v8 }
  0x13   :  { %245 = vmatpush3.bf16.msra.mxu0 %v267_v9 }
  0x14   :  { %246 = vmatprep.subr.bf16.mxu0 %v268_v10 }
  0x17   :  { %247 = vmatpush3.bf16.msra.mxu0 %v269_v13 }
  0x18   :  { %248 = vmatprep.subr.bf16.mxu0 %v270_v14 }
  0x1b   :  { %249 = vmatpush3.bf16.msra.mxu0 %v271_v15 }
  0x1c   :  { %250 = vmatprep.subr.bf16.mxu0 %v272_v16 }
  0x1f   :  { %251 = vmatpush3.bf16.msra.mxu0 %v273_v17 }
  0x22   :  { %190 = vmatmul.mubr.bf16.vlgmr.msra.gmra.mxu0 %v217_v18 }
  0xe2   :  { %v252_v19 = vpop.f32.mrf.mxu0 }
  0xe4   :  { %v253_v20 = vpop.f32.mrf.mxu0 }
  0xe5   :  { %v254_v22 = vadd.f32 %v253_v20, %v252_v19 }
  0xe6   :  { %v255_v23 = vpop.f32.mrf.mxu0 }
  0xe7   :  { %v210_v24 = vadd.f32 %v254_v22, %v235_v21 }
  0xe8   :  { %v256_v25 = vpop.f32.mrf.mxu0 }
  0xe9   :  { %v211_v26 = vmax.f32 %v210_v24, 0.0 }
  0xeb   :  { %212 = vst [vmem:[%s356_s3] sm:$0xff] %v211_v26 }

// kernel: _forward_impl.7
= control target key start
LH: loop header
LB: loop body
LE: loop exit
PB: predicated region body
PF: predicated region fallthrough
CT: control target
= control target key end

     0   :  { %v434_v0 = vmov 0.0   ;;  %vm435_vm0 = vmmov 0   ;;  %s540_s1 = inlined_call_operand.vmem [shape: bf16[384,128], index: 1, kind: input, shape index: {}]   ;;  %s541_s0 = inlined_call_operand.vmem [shape: bf16[8,384], index: 0, kind: input, shape index: {}]   ;;  %s542_s2 = inlined_call_operand.vmem [shape: f32[1,128], index: 2, kind: input, shape index: {}]   ;;  %s543_s3 = inlined_call_operand.vmem [shape: f32[8,128], index: 3, kind: output, shape index: {}]  }
   0x1   :  { %385 = vmatprep.subr.bf16.mxu1 %v434_v0  ;;  %v407_v1 = vld [vmem:[%s540_s1 + $0x78] sm:$0xff]   ;;  %401 = vmatprep.mubr.msk.bf16.mxu1 %vm435_vm0, %v434_v0  ;;  %v410_v4 = vld [vmem:[%s540_s1 + $0x70] sm:$0xff]   ;;  %v413_v7 = vld [vmem:[%s540_s1 + $0x68] sm:$0xff]  }
   0x2   :  { %v408_v2 = vld [vmem:[%s540_s1 + $0xb8] sm:$0xff]   ;;  %354 = vmatprep.subr.bf16.mxu0 %v407_v1  ;;  %v411_v5 = vld [vmem:[%s540_s1 + $0xb0] sm:$0xff]   ;;  %v414_v8 = vld [vmem:[%s540_s1 + $0xa8] sm:$0xff]  }
   0x3   :  { %v409_v3 = vld [vmem:[%s540_s1 + $0x38] sm:$0xff]   ;;  %386 = vmatpush3.bf16.msra.mxu1 %v408_v2  ;;  %v412_v6 = vld [vmem:[%s540_s1 + $0x30] sm:$0xff]   ;;  %v415_v9 = vld [vmem:[%s540_s1 + $0x28] sm:$0xff]  }
   0x4   :  { %355 = vmatpush3.bf16.msra.mxu0 %v409_v3  ;;  %387 = vmatprep.subr.bf16.mxu1 %v434_v0  ;;  %v416_v10 = vld [vmem:[%s540_s1 + $0x60] sm:$0xff]   ;;  %v419_v13 = vld [vmem:[%s540_s1 + $0x58] sm:$0xff]   ;;  %v422_v16 = vld [vmem:[%s540_s1 + $0x50] sm:$0xff]  }
   0x5   :  { %356 = vmatprep.subr.bf16.mxu0 %v410_v4  ;;  %v417_v11 = vld [vmem:[%s540_s1 + $0xa0] sm:$0xff]   ;;  %v420_v14 = vld [vmem:[%s540_s1 + $0x98] sm:$0xff]   ;;  %v423_v17 = vld [vmem:[%s540_s1 + $0x90] sm:$0xff]  }
   0x6   :  { %v418_v12 = vld [vmem:[%s540_s1 + $0x20] sm:$0xff]   ;;  %v421_v15 = vld [vmem:[%s540_s1 + $0x18] sm:$0xff]   ;;  %v424_v18 = vld [vmem:[%s540_s1 + $0x10] sm:$0xff]  }
   0x7   :  { %388 = vmatpush3.bf16.msra.mxu1 %v411_v5  ;;  %v425_v19 = vld [vmem:[%s540_s1 + $0x48] sm:$0xff]   ;;  %v21_v22 = vld [vmem:[%s541_s0] sm:$0xff] }
   0x8   :  { %357 = vmatpush3.bf16.msra.mxu0 %v412_v6  ;;  %389 = vmatprep.subr.bf16.mxu1 %v434_v0  ;;  %v426_v20 = vld [vmem:[%s540_s1 + $0x88] sm:$0xff]   ;;  %v428_v23 = vld [vmem:[%s540_s1 + $0x40] sm:$0xff]   ;;  %v327_v24 = vcombine.high %v21_v22, %v21_v22  ;;  %v326_v28 = vcombine.low %v21_v22, %v21_v22 }
   0x9   :  { %358 = vmatprep.subr.bf16.mxu0 %v413_v7  ;;  %v427_v21 = vld [vmem:[%s540_s1 + $0x8] sm:$0xff]   ;;  %v429_v25 = vld [vmem:[%s540_s1 + $0x80] sm:$0xff]  }
   0xa   :  { %258 = vmatprep.mubr.bf16.mxu0 %v327_v24  ;;  %v430_v26 = vld [vmem:[%s540_s1] sm:$0xff]   ;;  %v433_v27 = vld [vmem:[%s541_s0 + $0x8] ss:$0 sps:$4 sm:$0xff]  }
   0xb   :  { %390 = vmatpush3.bf16.msra.mxu1 %v414_v8  ;;  %v353_v35 = vld [vmem:[%s542_s2] ss:$0 sm:$0xff] }
   0xc   :  { %359 = vmatpush3.bf16.msra.mxu0 %v415_v9  ;;  %391 = vmatprep.subr.bf16.mxu1 %v434_v0 }
   0xd   :  { %360 = vmatprep.subr.bf16.mxu0 %v416_v10 }
   0xf   :  { %392 = vmatpush3.bf16.msra.mxu1 %v417_v11 }
  0x10   :  { %361 = vmatpush3.bf16.msra.mxu0 %v418_v12  ;;  %393 = vmatprep.subr.bf16.mxu1 %v434_v0 }
  0x11   :  { %362 = vmatprep.subr.bf16.mxu0 %v419_v13 }
  0x13   :  { %394 = vmatpush3.bf16.msra.mxu1 %v420_v14 }
  0x14   :  { %363 = vmatpush3.bf16.msra.mxu0 %v421_v15  ;;  %395 = vmatprep.subr.bf16.mxu1 %v434_v0 }
  0x15   :  { %364 = vmatprep.subr.bf16.mxu0 %v422_v16 }
  0x17   :  { %396 = vmatpush3.bf16.msra.mxu1 %v423_v17 }
  0x18   :  { %365 = vmatpush3.bf16.msra.mxu0 %v424_v18  ;;  %397 = vmatprep.subr.bf16.mxu1 %v434_v0 }
  0x19   :  { %366 = vmatprep.subr.bf16.mxu0 %v425_v19 }
  0x1b   :  { %398 = vmatpush3.bf16.msra.mxu1 %v426_v20 }
  0x1c   :  { %367 = vmatpush3.bf16.msra.mxu0 %v427_v21  ;;  %399 = vmatprep.subr.bf16.mxu1 %v434_v0 }
  0x1d   :  { %368 = vmatprep.subr.bf16.mxu0 %v428_v23 }
  0x1f   :  { %400 = vmatpush3.bf16.msra.mxu1 %v429_v25 }
  0x20   :  { %369 = vmatpush3.bf16.msra.mxu0 %v430_v26 }
  0x22   :  { %402 = vmatmul.mubr.bf16.vlgmr.msra.gmra.mxu1 %v433_v27 }
  0x23   :  { %259 = vmatmul.mubr.bf16.vlgmr.msra.gmra.mxu0 %v326_v28 }
  0xe2   :  { %v300_v29 = vpop.f32.mrf.mxu1 }
  0xe3   :  { %v370_v30 = vpop.f32.mrf.mxu0 }
  0xe4   :  { %v403_v31 = vpop.f32.mrf.mxu1 }
  0xe5   :  { %v371_v32 = vpop.f32.mrf.mxu0 }
  0xe6   :  { %v372_v33 = vadd.f32 %v371_v32, %v370_v30  ;;  %v303_v34 = vpop.f32.mrf.mxu1 }
  0xe7   :  { %v373_v36 = vpop.f32.mrf.mxu0 }
  0xe8   :  { %v301_v37 = vadd.f32 %v372_v33, %v300_v29  ;;  %v404_v38 = vpop.f32.mrf.mxu1 }
  0xe9   :  { %v374_v39 = vpop.f32.mrf.mxu0 }
  0xea   :  { %v319_v40 = vadd.f32 %v353_v35, %v301_v37 }
  0xec   :  { %v320_v41 = vmax.f32 %v319_v40, 0.0 }
  0xee   :  { %321 = vst [vmem:[%s543_s3] sm:$0xff] %v320_v41 }

</bundles_post_ra>
